<compile_context>
chip_gen: v7x
topology: tpu7x:2x2x1
jax: 0.10.0
libtpu: 0.0.40
codegen_flags: <defaults>
</compile_context>

<pallas_src>
import jax
import jax.numpy as jnp
from jax.experimental import pallas as pl
from jax.experimental.pallas import tpu as pltpu

HIDDEN = 32
STATE_DIM = 4


def odefunc_kernel(u_ref, w1_ref, b1_ref, w2_ref, a_ref, c_ref, out_ref):
    """Fused physics (affine) + MLP correction for one (TB, 4) batch tile.

    u_ref  : VMEM (TB, 4)   state tile [x1, y1, x2, y2]
    w1_ref : VMEM (4, H)    first layer weight   (resident)
    b1_ref : VMEM (1, H)    first layer bias     (resident)
    w2_ref : VMEM (H, 4)    second layer weight  (resident)
    a_ref  : VMEM (4, 4)    physics matrix A     (resident, built from p)
    c_ref  : VMEM (1, 4)    physics offset c + MLP bias b2 (resident)
    out_ref: VMEM (TB, 4)   phys + corr
    """
    u = u_ref[...]  # (TB, 4) f32

    # neural correction: tanh MLP (t is ignored by the synthetic model)
    h = jnp.tanh(
        jnp.dot(u, w1_ref[...], preferred_element_type=jnp.float32) + b1_ref[...]
    )                                                                 # (TB, H)
    corr = jnp.dot(h, w2_ref[...], preferred_element_type=jnp.float32)  # (TB, 4)

    # physics as a single tiny matmul: phys = u @ A  (+ c folded into c_ref)
    phys = jnp.dot(u, a_ref[...], preferred_element_type=jnp.float32)   # (TB, 4)

    out_ref[...] = (phys + corr + c_ref[...]).astype(out_ref.dtype)


def build_affine_physics(p, b2_mlp):
    """Fold p = [m1, m2, k1, k2, L1, L2, b1, b2] into phys = u @ A + c.

    Returns A (4,4) and c_total (1,4) with the MLP output bias pre-added.
    """
    m1, m2, k1, k2, L1, L2, b1p, b2p = (p[i] for i in range(8))
    z = jnp.zeros((), p.dtype)
    one = jnp.ones((), p.dtype)
    # rows = input component [x1, y1, x2, y2]; cols = output [dx1, dy1, dx2, dy2]
    A = jnp.stack(
        [
            jnp.stack([z,   -(k1 + k2) / m1, z,    k2 / m2]),
            jnp.stack([one, -b1p / m1,       z,    z]),
            jnp.stack([z,   k2 / m1,         z,   -k2 / m2]),
            jnp.stack([z,   z,               one, -b2p / m2]),
        ]
    )
    c = jnp.stack([z, (k1 * L1 - k2 * L2) / m1, z, k2 * L2 / m2])  # (4,)
    c_total = c[None, :] + b2_mlp  # (1, 4)
    return A, c_total


def odefunc_forward(t, u, p, w1, b1, w2, b2, *, tb=128):
    """Pallas wrapper. `t` is accepted for signature parity but unused by the model."""
    del t  # the assumed MLP correction does not depend on t
    B, D = u.shape
    assert D == STATE_DIM
    A, c_total = build_affine_physics(p, b2)

    tb = min(tb, B)
    grid = (pl.cdiv(B, tb),)

    # Batch-tiled u/out (pipelined, double-buffered); weights fully resident.
    tile_spec = pl.BlockSpec((tb, STATE_DIM), lambda i: (i, 0))
    resident = lambda shape: pl.BlockSpec(shape, lambda i: (0, 0))

    return pl.pallas_call(
        odefunc_kernel,
        out_shape=jax.ShapeDtypeStruct((B, D), u.dtype),
        grid=grid,
        in_specs=[
            tile_spec,                         # u
            resident(w1.shape),                # w1
            resident(b1.shape),                # b1
            resident(w2.shape),                # w2
            resident(A.shape),                 # A
            resident(c_total.shape),           # c + b2
        ],
        out_specs=tile_spec,
        compiler_params=pltpu.CompilerParams(
            dimension_semantics=("parallel",),  # v7x: shard batch grid over 2 TCs
        ),
    )(u, w1, b1, w2, A, c_total)


def reference_forward(t, u, p, w1, b1, w2, b2):
    """Pure-JAX reference mirroring the PyTorch module semantics."""
    x1, y1, x2, y2 = u[..., 0], u[..., 1], u[..., 2], u[..., 3]
    m1, m2, k1, k2, L1, L2, b1p, b2p = (p[i] for i in range(8))
    dx1 = y1
    dy1 = (-b1p * y1 - k1 * (x1 - L1) + k2 * (x2 - x1 - L2)) / m1
    dx2 = y2
    dy2 = (-b2p * y2 - k2 * (x2 - x1 - L2)) / m2
    phys = jnp.stack([dx1, dy1, dx2, dy2], axis=-1)
    corr = jnp.tanh(u @ w1 + b1) @ w2 + b2
    return phys + corr


if __name__ == "__main__":
    B = 256  # multiple of the 128-row batch tile
    key = jax.random.PRNGKey(0)
    k_u, k_w1, k_b1, k_w2, k_b2 = jax.random.split(key, 5)

    # physical parameters p = [m1, m2, k1, k2, L1, L2, b1, b2]
    p = jnp.array([1.0, 1.5, 8.0, 40.0, 0.5, 1.0, 0.5, 1.0], dtype=jnp.float32)

    # state batch u = [x1, y1, x2, y2] per row
    u = jax.random.normal(k_u, (B, STATE_DIM), dtype=jnp.float32)

    # deterministic synthetic MLP parameters
    w1 = jax.random.normal(k_w1, (STATE_DIM, HIDDEN), dtype=jnp.float32) * 0.1
    b1 = jax.random.normal(k_b1, (1, HIDDEN), dtype=jnp.float32) * 0.1
    w2 = jax.random.normal(k_w2, (HIDDEN, STATE_DIM), dtype=jnp.float32) * 0.1
    b2 = jax.random.normal(k_b2, (1, STATE_DIM), dtype=jnp.float32) * 0.1

    t = jnp.float32(0.0)

    out = odefunc_forward(t, u, p, w1, b1, w2, b2, tb=128)
    out = jax.block_until_ready(out)

    ref = reference_forward(t, u, p, w1, b1, w2, b2)
    assert out.shape == (B, STATE_DIM)
    assert jnp.allclose(out, ref, atol=1e-4, rtol=1e-5), "mismatch vs reference"

    print("KERNEL_OK")
</pallas_src>

<mosaic_0001>
module attributes {stable_mosaic.version = 11 : i64} {
  func.func @odefunc_kernel(%arg0: i32, %arg1: memref<128x4xf32, #tpu.memory_space<vmem>>, %arg2: memref<4x32xf32, #tpu.memory_space<vmem>>, %arg3: memref<1x32xf32, #tpu.memory_space<vmem>>, %arg4: memref<32x4xf32, #tpu.memory_space<vmem>>, %arg5: memref<4x4xf32, #tpu.memory_space<vmem>>, %arg6: memref<1x4xf32, #tpu.memory_space<vmem>>, %arg7: memref<128x4xf32, #tpu.memory_space<vmem>>) attributes {dimension_semantics = [#tpu.dimension_semantics<parallel>], iteration_bounds = array<i64: 2>, scalar_prefetch = 0 : i64, scratch_operands = 0 : i64, tpu.core_type = #tpu.core_type<tc>, window_params = [{transform_indices = @transform_0, window_bounds = array<i64: 128, 4>}, {pipeline_mode = #tpu.pipeline_mode<synchronous>, transform_indices = @transform_1, window_bounds = array<i64: 4, 32>}, {pipeline_mode = #tpu.pipeline_mode<synchronous>, transform_indices = @transform_2, window_bounds = array<i64: 1, 32>}, {pipeline_mode = #tpu.pipeline_mode<synchronous>, transform_indices = @transform_3, window_bounds = array<i64: 32, 4>}, {pipeline_mode = #tpu.pipeline_mode<synchronous>, transform_indices = @transform_4, window_bounds = array<i64: 4, 4>}, {pipeline_mode = #tpu.pipeline_mode<synchronous>, transform_indices = @transform_5, window_bounds = array<i64: 1, 4>}, {transform_indices = @transform_6, window_bounds = array<i64: 128, 4>}]} {
    %c0 = arith.constant 0 : index
    %c0_0 = arith.constant 0 : index
    %0 = vector.load %arg1[%c0, %c0_0] : memref<128x4xf32, #tpu.memory_space<vmem>>, vector<128x4xf32>
    %c0_1 = arith.constant 0 : index
    %c0_2 = arith.constant 0 : index
    %1 = vector.load %arg2[%c0_1, %c0_2] : memref<4x32xf32, #tpu.memory_space<vmem>>, vector<4x32xf32>
    %cst = arith.constant dense<0.000000e+00> : vector<128x32xf32>
    %2 = tpu.matmul %0, %1, %cst {dimension_numbers = #tpu.dot_dimension_numbers<[1], [0], [0], [1], [0, 0, 1, 1], [], []>} : vector<128x4xf32>, vector<4x32xf32>, vector<128x32xf32> -> vector<128x32xf32>
    %c0_3 = arith.constant 0 : index
    %c0_4 = arith.constant 0 : index
    %3 = vector.load %arg3[%c0_3, %c0_4] : memref<1x32xf32, #tpu.memory_space<vmem>>, vector<1x32xf32>
    %4 = vector.broadcast %3 : vector<1x32xf32> to vector<128x32xf32>
    %5 = arith.addf %2, %4 : vector<128x32xf32>
    %6 = math.tanh %5 : vector<128x32xf32>
    %c0_5 = arith.constant 0 : index
    %c0_6 = arith.constant 0 : index
    %7 = vector.load %arg4[%c0_5, %c0_6] : memref<32x4xf32, #tpu.memory_space<vmem>>, vector<32x4xf32>
    %cst_7 = arith.constant dense<0.000000e+00> : vector<128x4xf32>
    %8 = tpu.matmul %6, %7, %cst_7 {dimension_numbers = #tpu.dot_dimension_numbers<[1], [0], [0], [1], [0, 0, 1, 1], [], []>} : vector<128x32xf32>, vector<32x4xf32>, vector<128x4xf32> -> vector<128x4xf32>
    %c0_8 = arith.constant 0 : index
    %c0_9 = arith.constant 0 : index
    %9 = vector.load %arg5[%c0_8, %c0_9] : memref<4x4xf32, #tpu.memory_space<vmem>>, vector<4x4xf32>
    %cst_10 = arith.constant dense<0.000000e+00> : vector<128x4xf32>
    %10 = tpu.matmul %0, %9, %cst_10 {dimension_numbers = #tpu.dot_dimension_numbers<[1], [0], [0], [1], [0, 0, 1, 1], [], []>} : vector<128x4xf32>, vector<4x4xf32>, vector<128x4xf32> -> vector<128x4xf32>
    %11 = arith.addf %10, %8 : vector<128x4xf32>
    %c0_11 = arith.constant 0 : index
    %c0_12 = arith.constant 0 : index
    %12 = vector.load %arg6[%c0_11, %c0_12] : memref<1x4xf32, #tpu.memory_space<vmem>>, vector<1x4xf32>
    %13 = vector.broadcast %12 : vector<1x4xf32> to vector<128x4xf32>
    %14 = arith.addf %11, %13 : vector<128x4xf32>
    %c0_13 = arith.constant 0 : index
    %c0_14 = arith.constant 0 : index
    %15 = vector.load %arg7[%c0_13, %c0_14] : memref<128x4xf32, #tpu.memory_space<vmem>>, vector<128x4xf32>
    tpu.vector_store %arg7[%c0_13, %c0_14], %14 {strides = array<i32>} : memref<128x4xf32, #tpu.memory_space<vmem>>, vector<128x4xf32>,
    return
  }
  func.func @transform_0(%arg0: i32) -> (i32, i32) {
    %c0_i32 = arith.constant 0 : i32
    %c0_i32_0 = arith.constant 0 : i32
    return %arg0, %c0_i32 : i32, i32
  }
  func.func @transform_1(%arg0: i32) -> (i32, i32) {
    %c0_i32 = arith.constant 0 : i32
    %c0_i32_0 = arith.constant 0 : i32
    %c0_i32_1 = arith.constant 0 : i32
    return %c0_i32, %c0_i32_0 : i32, i32
  }
  func.func @transform_2(%arg0: i32) -> (i32, i32) {
    %c0_i32 = arith.constant 0 : i32
    %c0_i32_0 = arith.constant 0 : i32
    %c0_i32_1 = arith.constant 0 : i32
    return %c0_i32, %c0_i32_0 : i32, i32
  }
  func.func @transform_3(%arg0: i32) -> (i32, i32) {
    %c0_i32 = arith.constant 0 : i32
    %c0_i32_0 = arith.constant 0 : i32
    %c0_i32_1 = arith.constant 0 : i32
    return %c0_i32, %c0_i32_0 : i32, i32
  }
  func.func @transform_4(%arg0: i32) -> (i32, i32) {
    %c0_i32 = arith.constant 0 : i32
    %c0_i32_0 = arith.constant 0 : i32
    %c0_i32_1 = arith.constant 0 : i32
    return %c0_i32, %c0_i32_0 : i32, i32
  }
  func.func @transform_5(%arg0: i32) -> (i32, i32) {
    %c0_i32 = arith.constant 0 : i32
    %c0_i32_0 = arith.constant 0 : i32
    %c0_i32_1 = arith.constant 0 : i32
    return %c0_i32, %c0_i32_0 : i32, i32
  }
  func.func @transform_6(%arg0: i32) -> (i32, i32) {
    %c0_i32 = arith.constant 0 : i32
    %c0_i32_0 = arith.constant 0 : i32
    return %arg0, %c0_i32 : i32, i32
  }
}

</mosaic_0001>

<bundles_post_ra>
// kernel: tpu_custom_call.1
= control target key start
LH: loop header
LB: loop body
LE: loop exit
PB: predicated region body
PF: predicated region fallthrough
CT: control target
= control target key end

     0   :  { %s1247_s21 = smov 0   ;;  %s1485_s0 = inlined_call_operand.vmem [shape: f32[256,4], index: 0, kind: input, shape index: {}]   ;;  %s1486_s1 = inlined_call_operand.vmem [shape: f32[4,32], index: 1, kind: input, shape index: {}]   ;;  %s1487_s2 = inlined_call_operand.vmem [shape: f32[1,32], index: 2, kind: input, shape index: {}]   ;;  %s1488_s3 = inlined_call_operand.vmem [shape: f32[32,4], index: 3, kind: input, shape index: {}]   ;;  %s1489_s4 = inlined_call_operand.vmem [shape: f32[4,4], index: 4, kind: input, shape index: {}]   ;;  %s1490_s5 = inlined_call_operand.vmem [shape: f32[1,4], index: 5, kind: input, shape index: {}]   ;;  %s1491_s6 = inlined_call_operand.vmem [shape: f32[256,4], index: 6, kind: output, shape index: {}]  }
   0x1 LB: > { %s935_s22 = sadd.s32 4294967295, %s1210_s21   ;;  %p939_p0 = scmp.ge.s32.totalorder %s1210_s21, 1  ;;  %s1210_s21 = sphi %s1247_s21, %s16_s21  }
   0x2   : > { %p213_p1 = scmp.lt.s32.totalorder %s1210_s21, 3 }
   0x4   : > { %p214_p2 = pnand %p939_p0, %p213_p1 }
   0x5   : > { %v271_v0 = vld [vmem:[%s1486_s1] sm:$0xf] (!%p214_p2)  ;;  %vm328_vm0 = vcmask (!%p214_p2), 1043456   ;;  %s940_s25 = sshll.u32 (!%p214_p2), %s935_s22, 4  ;;  %vm279_vm1 = vcmask (!%p214_p2), 31744   ;;  %v494_v18 = vld [vmem:[%s1488_s3 + $0x8] sm:$0xff] (!%p214_p2) }
   0x6   : > { %217 = sbr.rel (%p214_p2) target bundleno = 521 (0x209), region = 44  ;;  %1052 = vmatprep.subr.msk.mxu0 (!%p214_p2), %vm328_vm0, %v271_v0  ;;  %p244_p3 = scmp.lt.s32.totalorder (!%p214_p2), %s940_s25, 31  ;;  %v493_v17 = vld [vmem:[%s1488_s3] sm:$0xff] (!%p214_p2)  ;;  %v495_v20 = vld [vmem:[%s1488_s3 + $0x10] sm:$0xff] (!%p214_p2)  ;;  %v496_v21 = vld [vmem:[%s1488_s3 + $0x18] sm:$0xff] (!%p214_p2)  ;;  %vm497_vm2 = vcmask (!%p214_p2), 261120  }
   0x7   : > { %1053 = vmatpush3.msk.msra.mxu0 (!%p214_p2), %vm328_vm0, %v271_v0  ;;  %v1136_v19 = vpack.c.bf16 (!%p214_p2), %v494_v18, %v493_v17  ;;  %v1140_v22 = vpack.c.bf16 (!%p214_p2), %v496_v21, %v495_v20  ;;  %v1365_v23 = vld [vmem:[%s1489_s4] sm:$0xf] (!%p214_p2) }
   0x8   : > { %v1372_v24 = vld [vmem:[%s1487_s2] ss:$0 sm:$0xff] (!%p214_p2) }
   0x9   : > { %1137 = vmatprep.subr.bf16.mxu0 (!%p214_p2), %v1136_v19  ;;  %1144 = vmatprep.subr.bf16.mxu1 (!%p214_p2), %v1136_v19 }
   0xa   : > { %1146 = vmatpush3.bf16.msra.mxu1 (!%p214_p2), %v1136_v19 }
   0xb   : > { %1145 = vmatprep.subr.bf16.mxu1 (!%p214_p2), %v1140_v22 }
   0xd   : > { %s1493_s25 = smov (!%p244_p3, %s940_s25), 31 }
   0xe   : > { %s941_s26 = sshll.u32 %s1493_s25, 3  ;;  %1147 = vmatpush3.bf16.msra.mxu1 %v1140_v22 }
   0xf   : > { %s1268_s29 = scalar_lea.vmem %s1485_s0, %s941_s26  ;;  %1110 = vmatprep.subr.msk.mxu1 %vm328_vm0, %v1365_v23  ;;  %s1448_s23 = scalar_lea.vmem %s1491_s6, %s941_s26 }
  0x10   : > { %v1271_v1 = vld [vmem:[%s1268_s29] sm:$0xff]  ;;  %v1274_v2 = vld [vmem:[%s1268_s29 + $0x8] sm:$0xff]  ;;  %v1277_v3 = vld [vmem:[%s1268_s29 + $0x10] sm:$0xff] }
  0x11   : > { %1054 = vmatprep.mubr.msk.f32.mxu0 %vm279_vm1, %v1271_v1  ;;  %v1286_v4 = vld [vmem:[%s1268_s29 + $0x18] sm:$0xff]  ;;  %v1289_v5 = vld [vmem:[%s1268_s29 + $0x20] sm:$0xff]  ;;  %v1296_v6 = vld [vmem:[%s1268_s29 + $0x28] sm:$0xff] }
  0x12   : > { %1055 = vmatmul.mubr.msk.f32.vlgmr.msra.gmra.mrb[0].mxu0 %vm279_vm1, %v1274_v2  ;;  %v1299_v7 = vld [vmem:[%s1268_s29 + $0x30] sm:$0xff]  ;;  %v1306_v8 = vld [vmem:[%s1268_s29 + $0x38] sm:$0xff]  ;;  %v1309_v9 = vld [vmem:[%s1268_s29 + $0x40] sm:$0xff] }
  0x13   : > { %1057 = vmatprep.mubr.msk.f32.mxu0 %vm279_vm1, %v1277_v3  ;;  %v1316_v10 = vld [vmem:[%s1268_s29 + $0x48] sm:$0xff]  ;;  %v1319_v11 = vld [vmem:[%s1268_s29 + $0x50] sm:$0xff]  ;;  %v1326_v12 = vld [vmem:[%s1268_s29 + $0x58] sm:$0xff]  ;;  %1139 = vmatpush3.bf16.msra.mxu0 %v1136_v19 }
  0x14   : > { %v1329_v13 = vld [vmem:[%s1268_s29 + $0x60] sm:$0xff]  ;;  %v1336_v14 = vld [vmem:[%s1268_s29 + $0x68] sm:$0xff]  ;;  %v1339_v15 = vld [vmem:[%s1268_s29 + $0x70] sm:$0xff]  ;;  %1141 = vmatprep.subr.bf16.mxu0 %v1140_v22 }
  0x15   : > { %v1346_v16 = vld [vmem:[%s1268_s29 + $0x78] sm:$0xff] }
  0x16   : > { %1058 = vmatmul.mubr.msk.f32.gmra.mrb[2].mxu0 %vm279_vm1, %v1286_v4 }
  0x17   : > { %1060 = vmatprep.mubr.msk.f32.mxu0 %vm279_vm1, %v1289_v5  ;;  %1143 = vmatpush3.bf16.msra.mxu0 %v1140_v22 }
  0x1a   : > { %1061 = vmatmul.mubr.msk.f32.gmra.mrb[4].mxu0 %vm279_vm1, %v1296_v6 }
  0x1b   : > { %1063 = vmatprep.mubr.msk.f32.mxu0 %vm279_vm1, %v1299_v7 }
  0x1e   : > { %1064 = vmatmul.mubr.msk.f32.gmra.mrb[6].mxu0 %vm279_vm1, %v1306_v8 }
  0x1f   : > { %1066 = vmatprep.mubr.msk.f32.mxu0 %vm279_vm1, %v1309_v9 }
  0x22   : > { %1067 = vmatmul.mubr.msk.f32.gmra.mrb[8].mxu0 %vm279_vm1, %v1316_v10 }
  0x23   : > { %1069 = vmatprep.mubr.msk.f32.mxu0 %vm279_vm1, %v1319_v11 }
  0x26   : > { %1070 = vmatmul.mubr.msk.f32.gmra.mrb[10].mxu0 %vm279_vm1, %v1326_v12 }
  0x27   : > { %1072 = vmatprep.mubr.msk.f32.mxu0 %vm279_vm1, %v1329_v13 }
  0x2a   : > { %1073 = vmatmul.mubr.msk.f32.gmra.mrb[12].mxu0 %vm279_vm1, %v1336_v14 }
  0x2b   : > { %1075 = vmatprep.mubr.msk.f32.mxu0 %vm279_vm1, %v1339_v15 }
  0x2e   : > { %1076 = vmatmul.mubr.msk.f32.gmra.mrb[14].mxu0 %vm279_vm1, %v1346_v16 }
  0xe5   : > { %v1056_v25 = vpop.f32.mrb[0].mxu0 }
  0xe6   : > { %v404_v26 = vadd.f32 %v1056_v25, %v1372_v24  ;;  %v398_v27 = vpop.f32.mrb[1].mxu0 }
  0xe7   : > { %v399_v28 = vadd.f32 %v1372_v24, %v398_v27 }
  0xe9   : > { %1172 = vtanh.f32 %v399_v28  ;;  %v1059_v29 = vpop.f32.mrb[2].mxu0 }
  0xea   : > { %1174 = vtanh.f32 %v404_v26  ;;  %v414_v30 = vadd.f32 %v1059_v29, %v1372_v24  ;;  %v408_v31 = vpop.f32.mrb[3].mxu0 }
  0xeb   : > { %v409_v32 = vadd.f32 %v1372_v24, %v408_v31 }
  0xed   : > { %1176 = vtanh.f32 %v409_v32  ;;  %v1062_v33 = vpop.f32.mrb[4].mxu0 }
  0xee   : > { %1178 = vtanh.f32 %v414_v30  ;;  %v424_v34 = vadd.f32 %v1062_v33, %v1372_v24  ;;  %v418_v35 = vpop.f32.mrb[5].mxu0 }
  0xef   : > { %v419_v36 = vadd.f32 %v1372_v24, %v418_v35 }
  0xf1   : > { %1180 = vtanh.f32 %v419_v36  ;;  %v1065_v37 = vpop.f32.mrb[6].mxu0 }
  0xf2   : > { %1182 = vtanh.f32 %v424_v34  ;;  %v434_v38 = vadd.f32 %v1065_v37, %v1372_v24  ;;  %v428_v39 = vpop.f32.mrb[7].mxu0 }
  0xf3   : > { %v1173_v40 = vpop.eup %1172  ;;  %v429_v41 = vadd.f32 %v1372_v24, %v428_v39 }
  0xf4   : > { %v1175_v42 = vpop.eup %1174  ;;  %1086 = vmatprep.mubr.msk.f32.mxu0 %vm497_vm2, %v1173_v40 }
  0xf5   : > { %1184 = vtanh.f32 %v429_v41  ;;  %v1068_v43 = vpop.f32.mrb[8].mxu0  ;;  %1087 = vmatmul.mubr.msk.f32.vlgmr.msra.gmra.mrb[16].mxu0 %vm497_vm2, %v1175_v42 }
  0xf6   : > { %1186 = vtanh.f32 %v434_v38  ;;  %v444_v44 = vadd.f32 %v1068_v43, %v1372_v24  ;;  %v438_v45 = vpop.f32.mrb[9].mxu0 }
  0xf7   : > { %v1177_v46 = vpop.eup %1176  ;;  %v439_v47 = vadd.f32 %v1372_v24, %v438_v45 }
  0xf8   : > { %v1179_v48 = vpop.eup %1178  ;;  %1089 = vmatprep.mubr.msk.f32.mxu0 %vm497_vm2, %v1177_v46 }
  0xf9   : > { %1188 = vtanh.f32 %v439_v47  ;;  %v1071_v49 = vpop.f32.mrb[10].mxu0  ;;  %1090 = vmatmul.mubr.msk.f32.gmra.mrb[18].mxu0 %vm497_vm2, %v1179_v48 }
  0xfa   : > { %1190 = vtanh.f32 %v444_v44  ;;  %v454_v50 = vadd.f32 %v1071_v49, %v1372_v24  ;;  %v448_v51 = vpop.f32.mrb[11].mxu0 }
  0xfb   : > { %v1181_v52 = vpop.eup %1180  ;;  %v449_v53 = vadd.f32 %v1372_v24, %v448_v51 }
  0xfc   : > { %v1183_v54 = vpop.eup %1182  ;;  %1092 = vmatprep.mubr.msk.f32.mxu0 %vm497_vm2, %v1181_v52 }
  0xfd   : > { %1192 = vtanh.f32 %v449_v53  ;;  %v1074_v55 = vpop.f32.mrb[12].mxu0  ;;  %1093 = vmatmul.mubr.msk.f32.gmra.mrb[20].mxu0 %vm497_vm2, %v1183_v54 }
  0xfe   : > { %1194 = vtanh.f32 %v454_v50  ;;  %v464_v56 = vadd.f32 %v1074_v55, %v1372_v24  ;;  %v458_v57 = vpop.f32.mrb[13].mxu0 }
  0xff   : > { %v1185_v58 = vpop.eup %1184  ;;  %v459_v59 = vadd.f32 %v1372_v24, %v458_v57 }
 0x100   : > { %v1187_v60 = vpop.eup %1186  ;;  %1095 = vmatprep.mubr.msk.f32.mxu0 %vm497_vm2, %v1185_v58 }
 0x101   : > { %1196 = vtanh.f32 %v459_v59  ;;  %v1077_v61 = vpop.f32.mrb[14].mxu0  ;;  %1096 = vmatmul.mubr.msk.f32.gmra.mrb[22].mxu0 %vm497_vm2, %v1187_v60 }
 0x102   : > { %1198 = vtanh.f32 %v464_v56  ;;  %v474_v62 = vadd.f32 %v1077_v61, %v1372_v24  ;;  %v468_v63 = vpop.f32.mrb[15].mxu0 }
 0x103   : > { %v1189_v0 = vpop.eup %1188  ;;  %v469_v17 = vadd.f32 %v1372_v24, %v468_v63 }
 0x104   : > { %v1191_v18 = vpop.eup %1190  ;;  %1098 = vmatprep.mubr.msk.f32.mxu1 %vm497_vm2, %v1189_v0 }
 0x105   : > { %1200 = vtanh.f32 %v469_v17  ;;  %1099 = vmatmul.mubr.msk.f32.vlgmr.msra.gmra.mrb[0].mxu1 %vm497_vm2, %v1191_v18 }
 0x106   : > { %1202 = vtanh.f32 %v474_v62  ;;  %1111 = vmatpush3.msk.msra.mxu1 %vm328_vm0, %v1365_v23 }
 0x107   : > { %v1193_v19 = vpop.eup %1192 }
 0x108   : > { %v1195_v20 = vpop.eup %1194  ;;  %1101 = vmatprep.mubr.msk.f32.mxu1 %vm497_vm2, %v1193_v19 }
 0x109   : > { %1102 = vmatmul.mubr.msk.f32.gmra.mrb[2].mxu1 %vm497_vm2, %v1195_v20 }
 0x10b   : > { %v1197_v21 = vpop.eup %1196 }
 0x10c   : > { %v1199_v22 = vpop.eup %1198  ;;  %1104 = vmatprep.mubr.msk.f32.mxu1 %vm497_vm2, %v1197_v21 }
 0x10d   : > { %1105 = vmatmul.mubr.msk.f32.gmra.mrb[4].mxu1 %vm497_vm2, %v1199_v22 }
 0x10f   : > { %v1201_v24 = vpop.eup %1200 }
 0x110   : > { %v1203_v25 = vpop.eup %1202  ;;  %1107 = vmatprep.mubr.msk.f32.mxu1 %vm497_vm2, %v1201_v24 }
 0x111   : > { %1108 = vmatmul.mubr.msk.f32.gmra.mrb[6].mxu1 %vm497_vm2, %v1203_v25 }
 0x112   : > { %1112 = vmatprep.mubr.msk.f32.mxu1 %vm279_vm1, %v1271_v1 }
 0x115   : > { %1113 = vmatmul.mubr.msk.f32.vlgmr.msra.gmra.mrb[8].mxu1 %vm279_vm1, %v1274_v2 }
 0x116   : > { %1115 = vmatprep.mubr.msk.f32.mxu1 %vm279_vm1, %v1277_v3 }
 0x119   : > { %1116 = vmatmul.mubr.msk.f32.gmra.mrb[10].mxu1 %vm279_vm1, %v1286_v4 }
 0x11a   : > { %1118 = vmatprep.mubr.msk.f32.mxu1 %vm279_vm1, %v1289_v5 }
 0x11d   : > { %1119 = vmatmul.mubr.msk.f32.gmra.mrb[12].mxu1 %vm279_vm1, %v1296_v6 }
 0x11e   : > { %1121 = vmatprep.mubr.msk.f32.mxu1 %vm279_vm1, %v1299_v7 }
 0x121   : > { %1122 = vmatmul.mubr.msk.f32.gmra.mrb[14].mxu1 %vm279_vm1, %v1306_v8 }
 0x122   : > { %1124 = vmatprep.mubr.msk.f32.mxu1 %vm279_vm1, %v1309_v9 }
 0x125   : > { %1125 = vmatmul.mubr.msk.f32.gmra.mrb[0].mxu1 %vm279_vm1, %v1316_v10  ;;  %v995_v10 = vld [vmem:[%s1490_s5] ss:$0 sm:$0xff] }
 0x126   : > { %1127 = vmatprep.mubr.msk.f32.mxu1 %vm279_vm1, %v1319_v11 }
 0x129   : > { %1128 = vmatmul.mubr.msk.f32.gmra.mrb[2].mxu1 %vm279_vm1, %v1326_v12 }
 0x12a   : > { %1130 = vmatprep.mubr.msk.f32.mxu1 %vm279_vm1, %v1329_v13 }
 0x12d   : > { %1131 = vmatmul.mubr.msk.f32.gmra.mrb[4].mxu1 %vm279_vm1, %v1336_v14 }
 0x12e   : > { %1133 = vmatprep.mubr.msk.f32.mxu1 %vm279_vm1, %v1339_v15 }
 0x131   : > { %1134 = vmatmul.mubr.msk.f32.gmra.mrb[6].mxu1 %vm279_vm1, %v1346_v16 }
 0x1c8   : > { %v1088_v1 = vpop.f32.mrb[16].mxu0 }
 0x1c9   : > { %v612_v2 = vpop.f32.mrb[17].mxu0 }
 0x1cc   : > { %v1091_v3 = vpop.f32.mrb[18].mxu0 }
 0x1cd   : > { %v622_v4 = vpop.f32.mrb[19].mxu0 }
 0x1d0   : > { %v1094_v5 = vpop.f32.mrb[20].mxu0 }
 0x1d1   : > { %v632_v6 = vpop.f32.mrb[21].mxu0 }
 0x1d4   : > { %v1097_v7 = vpop.f32.mrb[22].mxu0 }
 0x1d5   : > { %v642_v8 = vpop.f32.mrb[23].mxu0 }
 0x1e8   : > { %v1114_v9 = vpop.f32.mrb[8].mxu1 }
 0x1e9   : > { %v767_v11 = vadd.f32 %v1114_v9, %v1088_v1  ;;  %v761_v12 = vpop.f32.mrb[9].mxu1 }
 0x1ea   : > { %v762_v13 = vadd.f32 %v761_v12, %v612_v2 }
 0x1eb   : > { %v848_v14 = vadd.f32 %v995_v10, %v767_v11 }
 0x1ec   : > { %v847_v15 = vadd.f32 %v995_v10, %v762_v13  ;;  %v1117_v16 = vpop.f32.mrb[10].mxu1 }
 0x1ed   : > { %864 = vst.msk [vmem:[%s1448_s23 + $0x8] sm:$0xff] %vm279_vm1, %v848_v14  ;;  %v777_v23 = vadd.f32 %v1117_v16, %v1091_v3  ;;  %v771_v26 = vpop.f32.mrb[11].mxu1 }
 0x1ee   : > { %863 = vst.msk [vmem:[%s1448_s23] sm:$0xff] %vm279_vm1, %v847_v15  ;;  %v772_v27 = vadd.f32 %v771_v26, %v622_v4 }
 0x1ef   : > { %v850_v28 = vadd.f32 %v995_v10, %v777_v23 }
 0x1f0   : > { %v849_v29 = vadd.f32 %v995_v10, %v772_v27  ;;  %v1120_v30 = vpop.f32.mrb[12].mxu1 }
 0x1f1   : > { %866 = vst.msk [vmem:[%s1448_s23 + $0x18] sm:$0xff] %vm279_vm1, %v850_v28  ;;  %v787_v31 = vadd.f32 %v1120_v30, %v1094_v5  ;;  %v781_v32 = vpop.f32.mrb[13].mxu1 }
 0x1f2   : > { %865 = vst.msk [vmem:[%s1448_s23 + $0x10] sm:$0xff] %vm279_vm1, %v849_v29  ;;  %v782_v33 = vadd.f32 %v781_v32, %v632_v6 }
 0x1f3   : > { %v852_v34 = vadd.f32 %v995_v10, %v787_v31 }
 0x1f4   : > { %v851_v35 = vadd.f32 %v995_v10, %v782_v33  ;;  %v1123_v36 = vpop.f32.mrb[14].mxu1 }
 0x1f5   : > { %868 = vst.msk [vmem:[%s1448_s23 + $0x28] sm:$0xff] %vm279_vm1, %v852_v34  ;;  %v797_v37 = vadd.f32 %v1123_v36, %v1097_v7  ;;  %v791_v38 = vpop.f32.mrb[15].mxu1 }
 0x1f6   : > { %867 = vst.msk [vmem:[%s1448_s23 + $0x20] sm:$0xff] %vm279_vm1, %v851_v35  ;;  %v792_v39 = vadd.f32 %v791_v38, %v642_v8 }
 0x1f7   : > { %v854_v40 = vadd.f32 %v995_v10, %v797_v37 }
 0x1f8   : > { %v853_v41 = vadd.f32 %v995_v10, %v792_v39  ;;  %v1126_v42 = vpop.f32.mrb[0].mxu1 }
 0x1f9   : > { %870 = vst.msk [vmem:[%s1448_s23 + $0x38] sm:$0xff] %vm279_vm1, %v854_v40  ;;  %v856_v43 = vadd.f32 %v1126_v42, %v995_v10  ;;  %v801_v44 = vpop.f32.mrb[1].mxu1 }
 0x1fa   : > { %869 = vst.msk [vmem:[%s1448_s23 + $0x30] sm:$0xff] %vm279_vm1, %v853_v41  ;;  %v855_v45 = vadd.f32 %v995_v10, %v801_v44 }
 0x1fb   : > { %872 = vst.msk [vmem:[%s1448_s23 + $0x48] sm:$0xff] %vm279_vm1, %v856_v43 }
 0x1fc   : > { %871 = vst.msk [vmem:[%s1448_s23 + $0x40] sm:$0xff] %vm279_vm1, %v855_v45  ;;  %v1129_v46 = vpop.f32.mrb[2].mxu1 }
 0x1fd   : > { %v858_v47 = vadd.f32 %v1129_v46, %v995_v10  ;;  %v811_v48 = vpop.f32.mrb[3].mxu1 }
 0x1fe   : > { %v857_v49 = vadd.f32 %v995_v10, %v811_v48 }
 0x1ff   : > { %874 = vst.msk [vmem:[%s1448_s23 + $0x58] sm:$0xff] %vm279_vm1, %v858_v47 }
 0x200   : > { %873 = vst.msk [vmem:[%s1448_s23 + $0x50] sm:$0xff] %vm279_vm1, %v857_v49  ;;  %v1132_v50 = vpop.f32.mrb[4].mxu1 }
 0x201   : > { %v860_v51 = vadd.f32 %v1132_v50, %v995_v10  ;;  %v821_v52 = vpop.f32.mrb[5].mxu1 }
 0x202   : > { %v859_v53 = vadd.f32 %v995_v10, %v821_v52 }
 0x203   : > { %876 = vst.msk [vmem:[%s1448_s23 + $0x68] sm:$0xff] %vm279_vm1, %v860_v51 }
 0x204   : > { %875 = vst.msk [vmem:[%s1448_s23 + $0x60] sm:$0xff] %vm279_vm1, %v859_v53  ;;  %v1135_v54 = vpop.f32.mrb[6].mxu1 }
 0x205   : > { %v862_v55 = vadd.f32 %v1135_v54, %v995_v10  ;;  %v831_v56 = vpop.f32.mrb[7].mxu1 }
 0x206   : > { %v861_v57 = vadd.f32 %v995_v10, %v831_v56 }
 0x207   : > { %878 = vst.msk [vmem:[%s1448_s23 + $0x78] sm:$0xff] %vm279_vm1, %v862_v55 }
 0x208   : > { %877 = vst.msk [vmem:[%s1448_s23 + $0x70] sm:$0xff] %vm279_vm1, %v861_v57 }
 0x209 PF: > { %s16_s21 = sadd.s32 1, %s1210_s21  }
 0x20a   : > { %p13_p4 = scmp.ge.s32.totalorder %s16_s21, 4  }
 0x20c   :  { %15 = sbr.rel (!%p13_p4) target bundleno = 1 (0x1), region = 74 }

</bundles_post_ra>
